<compile_context>
chip_gen: v7x
topology: tpu7x:2x2x1
jax: 0.10.0
libtpu: 0.0.40
codegen_flags: <defaults>
</compile_context>

<pallas_src>
import jax
import jax.numpy as jnp
from jax.experimental import pallas as pl
from jax.experimental.pallas import tpu as pltpu


def _attention_kernel(x_ref, w1_ref, b1_ref, w2_ref, b2_ref, o_ref):
    """softmax(relu(x @ W1 + b1) @ W2 + b2, axis=-1) for one batch tile."""
    x = x_ref[...].astype(jnp.bfloat16)                       # bf16 MXU inputs
    h = jnp.dot(x, w1_ref[...], preferred_element_type=jnp.float32)
    h = jnp.maximum(h + b1_ref[...], 0.0)                     # bias + ReLU (VPU)
    s = jnp.dot(h.astype(jnp.bfloat16), w2_ref[...],
                preferred_element_type=jnp.float32) + b2_ref[...]
    m = jnp.max(s, axis=-1, keepdims=True)                    # row max (XLU)
    e = jnp.exp(s - m)                                        # EUP
    denom = jnp.sum(e, axis=-1, keepdims=True)
    # EUP reciprocal seed + one Newton step on the (bm, 1) denominator: keeps
    # the divide off the VALU but gives ~f32-exact row sums (raw approx alone
    # is only ~2^-8 .. 2^-12 accurate, which failed the row-sum check).
    inv = pl.reciprocal(denom, approx=True)
    inv = inv * (2.0 - denom * inv)
    o_ref[...] = (e * inv).astype(o_ref.dtype)


def _chip_info():
    """(tensorcores_per_device, vmem_limit_cap_bytes); safe fallback off-TPU."""
    try:
        kind = jax.devices()[0].device_kind.lower()
    except Exception:
        kind = ""
    if "tpu" not in kind:
        return 1, 100 << 20                      # CPU / interpret fallback
    small_vmem = "7" in kind                     # v7x-class: 64 MiB VMEM per TC
    two_tc = small_vmem or "v4" in kind or "v5p" in kind
    cap = (48 << 20) if small_vmem else (100 << 20)   # leave Mosaic headroom
    return (2 if two_tc else 1), cap


def _pick_bm(bs, d, num_tc, vmem_budget, w_bytes):
    """Largest batch tile whose working set fits VMEM, preferring a grid whose
    length is a multiple of the TensorCore count (so both v7x cores get work)."""
    def step_bytes(bm):
        io = 2 * 2 * bm * d * 4          # x tile + out tile, double-buffered, f32
        inter = 16 * bm * d              # h(f32), s, e + bf16 copies of x and h
        return w_bytes + io + inter

    cands = [c for c in range(8, bs + 1, 8) if bs % c == 0] or [bs]
    for require_multicore in (True, False):
        for bm in sorted(cands, reverse=True):
            if require_multicore and (bs // bm) % num_tc != 0:
                continue
            if step_bytes(bm) <= vmem_budget:
                return bm
    return min(cands)


def attention_forward(x, w1, b1, w2, b2, *, bm=None, out_dtype=None):
    """Fused Linear->ReLU->Linear->softmax.  x: (bs, D) f32; weights bf16."""
    bs, d = x.shape
    assert d % 128 == 0, "embed_dim must be lane-aligned (multiple of 128)"
    out_dtype = x.dtype if out_dtype is None else jnp.dtype(out_dtype)

    num_tc, vmem_cap = _chip_info()
    # Single-buffered resident weights + biases.
    w_bytes = (w1.size + w2.size) * w1.dtype.itemsize + (b1.size + b2.size) * 4
    if bm is None:
        bm = _pick_bm(bs, d, num_tc, int(0.7 * vmem_cap), w_bytes)
    assert bs % bm == 0 and (bm % 8 == 0 or bm == bs)
    grid = (bs // bm,)

    # VMEM budget, including in-kernel intermediates (h/s/e f32 + bf16 copies).
    io_bytes = 2 * bm * d * (x.dtype.itemsize + jnp.dtype(out_dtype).itemsize)
    inter_bytes = 16 * bm * d
    vmem_needed = w_bytes + io_bytes + inter_bytes
    # Only override the default scoped limit when it would actually bind, and
    # never hand Mosaic the whole physical VMEM (generation-aware cap above).
    vmem_limit = None
    if vmem_needed > (12 << 20):
        vmem_limit = min(int(vmem_needed * 1.5), vmem_cap)
    # TODO(synk): if the single-buffered weights alone exceed the cap
    # (embed_dim >~ 3k on 64-MiB-VMEM chips), a K/N-tiled weight grid axis with
    # a pl.when-guarded accumulator is needed; not implemented here.

    cost = pl.CostEstimate(
        flops=4 * bs * d * d,                                 # two matmuls
        transcendentals=bs * d + 2 * bs,                      # exp + rcp/Newton
        bytes_accessed=bs * d * x.dtype.itemsize + w_bytes
        + bs * d * jnp.dtype(out_dtype).itemsize,
    )

    def build_call(single_buffer_weights):
        # Weights/biases never change across the grid; single-buffer them.
        res_kw = ({"pipeline_mode": pl.Buffered(buffer_count=1)}
                  if single_buffer_weights else {})
        grid_spec = pltpu.PrefetchScalarGridSpec(
            num_scalar_prefetch=0,
            grid=grid,
            in_specs=[
                pl.BlockSpec((bm, d), lambda i: (i, 0)),            # x tile
                pl.BlockSpec((d, d), lambda i: (0, 0), **res_kw),   # W1 (resident)
                pl.BlockSpec((1, d), lambda i: (0, 0), **res_kw),   # b1
                pl.BlockSpec((d, d), lambda i: (0, 0), **res_kw),   # W2 (resident)
                pl.BlockSpec((1, d), lambda i: (0, 0), **res_kw),   # b2
            ],
            out_specs=pl.BlockSpec((bm, d), lambda i: (i, 0)),
        )
        return pl.pallas_call(
            _attention_kernel,
            out_shape=jax.ShapeDtypeStruct((bs, d), out_dtype),
            grid_spec=grid_spec,
            compiler_params=pltpu.CompilerParams(
                dimension_semantics=("parallel",),
                vmem_limit_bytes=vmem_limit),
            cost_estimate=cost,
        )

    try:
        return build_call(True)(x, w1, b1, w2, b2)
    except Exception:
        # TODO(synk): Buffered(1) single-buffering of the grid-invariant
        # weights is a pure VMEM optimization; fall back to the default
        # double-buffered pipeline if this jax/Mosaic build rejects it.
        return build_call(False)(x, w1, b1, w2, b2)


def _init_linear(key, fan_in, fan_out):
    """PyTorch-style nn.Linear init: U(-1/sqrt(fan_in), +1/sqrt(fan_in))."""
    kw, kb = jax.random.split(key)
    bound = 1.0 / (fan_in ** 0.5)
    w = jax.random.uniform(kw, (fan_in, fan_out), jnp.float32, -bound, bound)
    b = jax.random.uniform(kb, (1, fan_out), jnp.float32, -bound, bound)
    # Weights live in bf16 (MXU-native, half the HBM/DMA bytes); biases stay
    # f32 and are added to the f32 accumulator inside the kernel.
    return w.astype(jnp.bfloat16), b


class SimpleModelTextOnlyWithAttnPallas:
    def __init__(self, batch_size, embed_dim, key):
        self.bs = batch_size
        self.embed_dim = embed_dim
        k1, k2 = jax.random.split(key)
        self.w1, self.b1 = _init_linear(k1, embed_dim, embed_dim)
        self.w2, self.b2 = _init_linear(k2, embed_dim, embed_dim)

    def __call__(self, img_emb, text_emb, cell_id):
        # img_emb is unused by the reference forward pass.
        # NOTE: cell_id drives Python-level control flow (mirroring the PyTorch
        # module); make it a static arg if this is ever placed under jax.jit.
        text = attention_forward(text_emb, self.w1, self.b1, self.w2, self.b2)
        if cell_id != 0:
            # Reference: res[i] = text_emb[i].repeat_interleave(32, 0), with
            # text_emb rebound to the attention OUTPUT above.
            # TODO(synk): the literal PyTorch assignment only type-checks when
            # the flat (32*embed_dim,) repeat can be viewed as (bs, embed_dim),
            # i.e. bs == 32; we reproduce that reinterpretation as plain-JAX
            # layout plumbing (an in-kernel interleave would need a
            # lane-crossing reshape for a ~0.5 MiB store -- not worth a kernel).
            assert self.bs == 32, "repeat_interleave branch requires bs == 32"
            flat = jnp.repeat(text, 32, axis=-1)            # (bs, 32*D)
            return flat.reshape(self.bs, self.bs, self.embed_dim)
        return text


if __name__ == "__main__":
    bs, embed_dim = 32, 128
    key = jax.random.PRNGKey(0)
    kp, ki, kt = jax.random.split(key, 3)

    model = SimpleModelTextOnlyWithAttnPallas(bs, embed_dim, kp)
    img_emb = jax.random.normal(ki, (bs, embed_dim), jnp.float32)   # unused
    text_emb = jax.random.normal(kt, (bs, embed_dim), jnp.float32)

    # cell_id == 0 path: attention output (bs, embed_dim)
    out0 = jax.block_until_ready(model(img_emb, text_emb, cell_id=0))
    assert out0.shape == (bs, embed_dim)
    # softmax rows must sum to 1 (Newton-refined reciprocal => ~f32 exact)
    row_sums = jnp.sum(out0, axis=-1)
    assert jnp.allclose(row_sums, 1.0, atol=1e-3), (
        float(jnp.max(jnp.abs(row_sums - 1.0))))

    # cross-check against a plain-JAX reference with matching numerics
    # (bf16 MXU inputs, f32 accumulation).
    xb = text_emb.astype(jnp.bfloat16)
    ref_h = jnp.maximum(
        jnp.dot(xb, model.w1, preferred_element_type=jnp.float32) + model.b1, 0.0)
    ref_s = jnp.dot(ref_h.astype(jnp.bfloat16), model.w2,
                    preferred_element_type=jnp.float32) + model.b2
    ref = jax.nn.softmax(ref_s, axis=-1)
    assert jnp.allclose(out0, ref, atol=5e-4, rtol=5e-3), (
        float(jnp.max(jnp.abs(out0 - ref))))

    # cell_id != 0 path: (bs, bs, embed_dim) repeat-interleaved layout
    out1 = jax.block_until_ready(model(img_emb, text_emb, cell_id=1))
    assert out1.shape == (bs, bs, embed_dim)

    # exercise the large-batch path (auto bm: whole batch on 1-TC chips,
    # grid divisible by 2 on v7x-class chips)
    big_bs = 512
    big_x = jax.random.normal(jax.random.fold_in(kt, 1),
                              (big_bs, embed_dim), jnp.float32)
    big_out = jax.block_until_ready(
        attention_forward(big_x, model.w1, model.b1, model.w2, model.b2))
    assert big_out.shape == (big_bs, embed_dim)
    assert jnp.allclose(jnp.sum(big_out, axis=-1), 1.0, atol=1e-3)

    # explicit multi-step grid (bm=256 -> grid=(2,)) must match the fused run
    tiled_out = jax.block_until_ready(
        attention_forward(big_x, model.w1, model.b1, model.w2, model.b2, bm=256))
    assert jnp.allclose(tiled_out, big_out, atol=5e-4, rtol=5e-3)

    print("KERNEL_OK")
</pallas_src>

<mosaic_0001>
module attributes {stable_mosaic.version = 11 : i64} {
  func.func @_attention_kernel(%arg0: i32, %arg1: memref<32x128xf32, #tpu.memory_space<vmem>>, %arg2: memref<128x128xbf16, #tpu.memory_space<vmem>>, %arg3: memref<1x128xf32, #tpu.memory_space<vmem>>, %arg4: memref<128x128xbf16, #tpu.memory_space<vmem>>, %arg5: memref<1x128xf32, #tpu.memory_space<vmem>>, %arg6: memref<32x128xf32, #tpu.memory_space<vmem>>) attributes {dimension_semantics = [#tpu.dimension_semantics<parallel>], iteration_bounds = array<i64: 1>, scalar_prefetch = 0 : i64, scratch_operands = 0 : i64, tpu.core_type = #tpu.core_type<tc>, window_params = [{transform_indices = @transform_0, window_bounds = array<i64: 32, 128>}, {pipeline_mode = #tpu.pipeline_mode<synchronous>, transform_indices = @transform_1, window_bounds = array<i64: 128, 128>}, {pipeline_mode = #tpu.pipeline_mode<synchronous>, transform_indices = @transform_2, window_bounds = array<i64: 1, 128>}, {pipeline_mode = #tpu.pipeline_mode<synchronous>, transform_indices = @transform_3, window_bounds = array<i64: 128, 128>}, {pipeline_mode = #tpu.pipeline_mode<synchronous>, transform_indices = @transform_4, window_bounds = array<i64: 1, 128>}, {transform_indices = @transform_5, window_bounds = array<i64: 32, 128>}]} {
    %c0 = arith.constant 0 : index
    %c0_0 = arith.constant 0 : index
    %0 = vector.load %arg1[%c0, %c0_0] : memref<32x128xf32, #tpu.memory_space<vmem>>, vector<32x128xf32>
    %1 = arith.truncf %0 : vector<32x128xf32> to vector<32x128xbf16>
    %c0_1 = arith.constant 0 : index
    %c0_2 = arith.constant 0 : index
    %2 = vector.load %arg2[%c0_1, %c0_2] : memref<128x128xbf16, #tpu.memory_space<vmem>>, vector<128x128xbf16>
    %cst = arith.constant dense<0.000000e+00> : vector<32x128xf32>
    %3 = tpu.matmul %1, %2, %cst {dimension_numbers = #tpu.dot_dimension_numbers<[1], [0], [0], [1], [0, 0, 1, 1], [], []>} : vector<32x128xbf16>, vector<128x128xbf16>, vector<32x128xf32> -> vector<32x128xf32>
    %c0_3 = arith.constant 0 : index
    %c0_4 = arith.constant 0 : index
    %4 = vector.load %arg3[%c0_3, %c0_4] : memref<1x128xf32, #tpu.memory_space<vmem>>, vector<1x128xf32>
    %5 = vector.broadcast %4 : vector<1x128xf32> to vector<32x128xf32>
    %6 = arith.addf %3, %5 : vector<32x128xf32>
    %cst_5 = arith.constant 0.000000e+00 : f32
    %7 = vector.broadcast %cst_5 : f32 to vector<32x128xf32>
    %8 = arith.maximumf %6, %7 : vector<32x128xf32>
    %9 = arith.truncf %8 : vector<32x128xf32> to vector<32x128xbf16>
    %c0_6 = arith.constant 0 : index
    %c0_7 = arith.constant 0 : index
    %10 = vector.load %arg4[%c0_6, %c0_7] : memref<128x128xbf16, #tpu.memory_space<vmem>>, vector<128x128xbf16>
    %cst_8 = arith.constant dense<0.000000e+00> : vector<32x128xf32>
    %11 = tpu.matmul %9, %10, %cst_8 {dimension_numbers = #tpu.dot_dimension_numbers<[1], [0], [0], [1], [0, 0, 1, 1], [], []>} : vector<32x128xbf16>, vector<128x128xbf16>, vector<32x128xf32> -> vector<32x128xf32>
    %c0_9 = arith.constant 0 : index
    %c0_10 = arith.constant 0 : index
    %12 = vector.load %arg5[%c0_9, %c0_10] : memref<1x128xf32, #tpu.memory_space<vmem>>, vector<1x128xf32>
    %13 = vector.broadcast %12 : vector<1x128xf32> to vector<32x128xf32>
    %14 = arith.addf %11, %13 : vector<32x128xf32>
    %cst_11 = arith.constant dense<0xFF800000> : vector<32xf32>
    %15 = vector.multi_reduction <maximumf>, %14, %cst_11 [1] : vector<32x128xf32> to vector<32xf32>
    %16 = vector.shape_cast %15 : vector<32xf32> to vector<32x1xf32>
    %17 = vector.broadcast %16 : vector<32x1xf32> to vector<32x128xf32>
    %18 = arith.subf %14, %17 : vector<32x128xf32>
    %19 = math.exp %18 : vector<32x128xf32>
    %cst_12 = arith.constant dense<0.000000e+00> : vector<32xf32>
    %20 = vector.multi_reduction <add>, %19, %cst_12 [1] : vector<32x128xf32> to vector<32xf32>
    %21 = vector.shape_cast %20 : vector<32xf32> to vector<32x1xf32>
    %22 = tpu.reciprocal %21 {approx = true} : vector<32x1xf32> -> vector<32x1xf32>
    %23 = arith.mulf %21, %22 : vector<32x1xf32>
    %cst_13 = arith.constant 2.000000e+00 : f32
    %24 = vector.broadcast %cst_13 : f32 to vector<32x1xf32>
    %25 = arith.subf %24, %23 : vector<32x1xf32>
    %26 = arith.mulf %22, %25 : vector<32x1xf32>
    %27 = vector.broadcast %26 : vector<32x1xf32> to vector<32x128xf32>
    %28 = arith.mulf %19, %27 : vector<32x128xf32>
    %c0_14 = arith.constant 0 : index
    %c0_15 = arith.constant 0 : index
    %29 = vector.load %arg6[%c0_14, %c0_15] : memref<32x128xf32, #tpu.memory_space<vmem>>, vector<32x128xf32>
    tpu.vector_store %arg6[%c0_14, %c0_15], %28 {strides = array<i32>} : memref<32x128xf32, #tpu.memory_space<vmem>>, vector<32x128xf32>,
    return
  }
  func.func @transform_0(%arg0: i32) -> (i32, i32) {
    %c0_i32 = arith.constant 0 : i32
    %c0_i32_0 = arith.constant 0 : i32
    return %arg0, %c0_i32 : i32, i32
  }
  func.func @transform_1(%arg0: i32) -> (i32, i32) {
    %c0_i32 = arith.constant 0 : i32
    %c0_i32_0 = arith.constant 0 : i32
    %c0_i32_1 = arith.constant 0 : i32
    return %c0_i32, %c0_i32_0 : i32, i32
  }
  func.func @transform_2(%arg0: i32) -> (i32, i32) {
    %c0_i32 = arith.constant 0 : i32
    %c0_i32_0 = arith.constant 0 : i32
    %c0_i32_1 = arith.constant 0 : i32
    return %c0_i32, %c0_i32_0 : i32, i32
  }
  func.func @transform_3(%arg0: i32) -> (i32, i32) {
    %c0_i32 = arith.constant 0 : i32
    %c0_i32_0 = arith.constant 0 : i32
    %c0_i32_1 = arith.constant 0 : i32
    return %c0_i32, %c0_i32_0 : i32, i32
  }
  func.func @transform_4(%arg0: i32) -> (i32, i32) {
    %c0_i32 = arith.constant 0 : i32
    %c0_i32_0 = arith.constant 0 : i32
    %c0_i32_1 = arith.constant 0 : i32
    return %c0_i32, %c0_i32_0 : i32, i32
  }
  func.func @transform_5(%arg0: i32) -> (i32, i32) {
    %c0_i32 = arith.constant 0 : i32
    %c0_i32_0 = arith.constant 0 : i32
    return %arg0, %c0_i32 : i32, i32
  }
}

module attributes {stable_mosaic.version = 11 : i64} {
  func.func @_attention_kernel(%arg0: i32, %arg1: memref<32x128xf32, #tpu.memory_space<vmem>>, %arg2: memref<128x128xbf16, #tpu.memory_space<vmem>>, %arg3: memref<1x128xf32, #tpu.memory_space<vmem>>, %arg4: memref<128x128xbf16, #tpu.memory_space<vmem>>, %arg5: memref<1x128xf32, #tpu.memory_space<vmem>>, %arg6: memref<32x128xf32, #tpu.memory_space<vmem>>) attributes {dimension_semantics = [#tpu.dimension_semantics<parallel>], iteration_bounds = array<i64: 1>, scalar_prefetch = 0 : i64, scratch_operands = 0 : i64, tpu.core_type = #tpu.core_type<tc>, window_params = [{transform_indices = @transform_0, window_bounds = array<i64: 32, 128>}, {pipeline_mode = #tpu.pipeline_mode<synchronous>, transform_indices = @transform_1, window_bounds = array<i64: 128, 128>}, {pipeline_mode = #tpu.pipeline_mode<synchronous>, transform_indices = @transform_2, window_bounds = array<i64: 1, 128>}, {pipeline_mode = #tpu.pipeline_mode<synchronous>, transform_indices = @transform_3, window_bounds = array<i64: 128, 128>}, {pipeline_mode = #tpu.pipeline_mode<synchronous>, transform_indices = @transform_4, window_bounds = array<i64: 1, 128>}, {transform_indices = @transform_5, window_bounds = array<i64: 32, 128>}]} {
    %c0 = arith.constant 0 : index
    %c0_0 = arith.constant 0 : index
    %0 = vector.load %arg1[%c0, %c0_0] : memref<32x128xf32, #tpu.memory_space<vmem>>, vector<32x128xf32>
    %1 = arith.truncf %0 : vector<32x128xf32> to vector<32x128xbf16>
    %c0_1 = arith.constant 0 : index
    %c0_2 = arith.constant 0 : index
    %2 = vector.load %arg2[%c0_1, %c0_2] : memref<128x128xbf16, #tpu.memory_space<vmem>>, vector<128x128xbf16>
    %cst = arith.constant dense<0.000000e+00> : vector<32x128xf32>
    %3 = tpu.matmul %1, %2, %cst {dimension_numbers = #tpu.dot_dimension_numbers<[1], [0], [0], [1], [0, 0, 1, 1], [], []>} : vector<32x128xbf16>, vector<128x128xbf16>, vector<32x128xf32> -> vector<32x128xf32>
    %c0_3 = arith.constant 0 : index
    %c0_4 = arith.constant 0 : index
    %4 = vector.load %arg3[%c0_3, %c0_4] : memref<1x128xf32, #tpu.memory_space<vmem>>, vector<1x128xf32>
    %5 = vector.broadcast %4 : vector<1x128xf32> to vector<32x128xf32>
    %6 = arith.addf %3, %5 : vector<32x128xf32>
    %cst_5 = arith.constant 0.000000e+00 : f32
    %7 = vector.broadcast %cst_5 : f32 to vector<32x128xf32>
    %8 = arith.maximumf %6, %7 : vector<32x128xf32>
    %9 = arith.truncf %8 : vector<32x128xf32> to vector<32x128xbf16>
    %c0_6 = arith.constant 0 : index
    %c0_7 = arith.constant 0 : index
    %10 = vector.load %arg4[%c0_6, %c0_7] : memref<128x128xbf16, #tpu.memory_space<vmem>>, vector<128x128xbf16>
    %cst_8 = arith.constant dense<0.000000e+00> : vector<32x128xf32>
    %11 = tpu.matmul %9, %10, %cst_8 {dimension_numbers = #tpu.dot_dimension_numbers<[1], [0], [0], [1], [0, 0, 1, 1], [], []>} : vector<32x128xbf16>, vector<128x128xbf16>, vector<32x128xf32> -> vector<32x128xf32>
    %c0_9 = arith.constant 0 : index
    %c0_10 = arith.constant 0 : index
    %12 = vector.load %arg5[%c0_9, %c0_10] : memref<1x128xf32, #tpu.memory_space<vmem>>, vector<1x128xf32>
    %13 = vector.broadcast %12 : vector<1x128xf32> to vector<32x128xf32>
    %14 = arith.addf %11, %13 : vector<32x128xf32>
    %cst_11 = arith.constant dense<0xFF800000> : vector<32xf32>
    %15 = vector.multi_reduction <maximumf>, %14, %cst_11 [1] : vector<32x128xf32> to vector<32xf32>
    %16 = vector.shape_cast %15 : vector<32xf32> to vector<32x1xf32>
    %17 = vector.broadcast %16 : vector<32x1xf32> to vector<32x128xf32>
    %18 = arith.subf %14, %17 : vector<32x128xf32>
    %19 = math.exp %18 : vector<32x128xf32>
    %cst_12 = arith.constant dense<0.000000e+00> : vector<32xf32>
    %20 = vector.multi_reduction <add>, %19, %cst_12 [1] : vector<32x128xf32> to vector<32xf32>
    %21 = vector.shape_cast %20 : vector<32xf32> to vector<32x1xf32>
    %22 = tpu.reciprocal %21 {approx = true} : vector<32x1xf32> -> vector<32x1xf32>
    %23 = arith.mulf %21, %22 : vector<32x1xf32>
    %cst_13 = arith.constant 2.000000e+00 : f32
    %24 = vector.broadcast %cst_13 : f32 to vector<32x1xf32>
    %25 = arith.subf %24, %23 : vector<32x1xf32>
    %26 = arith.mulf %22, %25 : vector<32x1xf32>
    %27 = vector.broadcast %26 : vector<32x1xf32> to vector<32x128xf32>
    %28 = arith.mulf %19, %27 : vector<32x128xf32>
    %c0_14 = arith.constant 0 : index
    %c0_15 = arith.constant 0 : index
    %29 = vector.load %arg6[%c0_14, %c0_15] : memref<32x128xf32, #tpu.memory_space<vmem>>, vector<32x128xf32>
    tpu.vector_store %arg6[%c0_14, %c0_15], %28 {strides = array<i32>} : memref<32x128xf32, #tpu.memory_space<vmem>>, vector<32x128xf32>,
    return
  }
  func.func @transform_0(%arg0: i32) -> (i32, i32) {
    %c0_i32 = arith.constant 0 : i32
    %c0_i32_0 = arith.constant 0 : i32
    return %arg0, %c0_i32 : i32, i32
  }
  func.func @transform_1(%arg0: i32) -> (i32, i32) {
    %c0_i32 = arith.constant 0 : i32
    %c0_i32_0 = arith.constant 0 : i32
    %c0_i32_1 = arith.constant 0 : i32
    return %c0_i32, %c0_i32_0 : i32, i32
  }
  func.func @transform_2(%arg0: i32) -> (i32, i32) {
    %c0_i32 = arith.constant 0 : i32
    %c0_i32_0 = arith.constant 0 : i32
    %c0_i32_1 = arith.constant 0 : i32
    return %c0_i32, %c0_i32_0 : i32, i32
  }
  func.func @transform_3(%arg0: i32) -> (i32, i32) {
    %c0_i32 = arith.constant 0 : i32
    %c0_i32_0 = arith.constant 0 : i32
    %c0_i32_1 = arith.constant 0 : i32
    return %c0_i32, %c0_i32_0 : i32, i32
  }
  func.func @transform_4(%arg0: i32) -> (i32, i32) {
    %c0_i32 = arith.constant 0 : i32
    %c0_i32_0 = arith.constant 0 : i32
    %c0_i32_1 = arith.constant 0 : i32
    return %c0_i32, %c0_i32_0 : i32, i32
  }
  func.func @transform_5(%arg0: i32) -> (i32, i32) {
    %c0_i32 = arith.constant 0 : i32
    %c0_i32_0 = arith.constant 0 : i32
    return %arg0, %c0_i32 : i32, i32
  }
}

</mosaic_0001>

<bundles_post_ra>
// kernel: tpu_custom_call.1
= control target key start
LH: loop header
LB: loop body
LE: loop exit
PB: predicated region body
PF: predicated region fallthrough
CT: control target
= control target key end

     0   :  { %10 = vsyncpa [#allocation3], 0  ;;  %s701_s0 = inlined_call_operand.hbm [shape: f32[32,128], index: 0, kind: input, shape index: {}]   ;;  %s702_s1 = inlined_call_operand.hbm [shape: bf16[128,128], index: 1, kind: input, shape index: {}]   ;;  %s703_s2 = inlined_call_operand.vmem [shape: f32[1,128], index: 2, kind: input, shape index: {}]   ;;  %s704_s3 = inlined_call_operand.hbm [shape: bf16[128,128], index: 3, kind: input, shape index: {}]   ;;  %s705_s4 = inlined_call_operand.vmem [shape: f32[1,128], index: 4, kind: input, shape index: {}]   ;;  %s706_s5 = inlined_call_operand.hbm [shape: f32[32,128], index: 5, kind: output, shape index: {}]  }
   0x1   :  { %11 = vsyncpa [#allocation6], 0 }
   0x2   :  { %12 = vsyncpa [#allocation4], 0  ;;  %s597_s18 = smov [#allocation5]   ;;  %s503_s22 = scalar_lea.hbm %s702_s1, 1024 }
   0x3   :  { %s30_s19 = sshll.u32 %s597_s18, 4  ;;  %p504_p0 = scmp.ne.s32.totalorder %s702_s1, %s503_s22  ;;  %s31_s19 = int_to_ptr.vmem [resolvable:$true] %s30_s19 }
   0x4   :  { %p507_p1 = scmp.lt.u32.totalorder %s503_s22, %s702_s1 }
   0x6   :  { %p509_p2 = pnand %p507_p1, %p504_p0 }
   0x8   :  { %512 = shalt.err (!%p509_p2)
}
   0x9   :  { %s513_s27 = scalar_lea.vmem %s31_s19, 1024  ;;  %p518_p4 = scmp.lt.s32.totalorder %s31_s19, %s31_s19 }
   0xa   :  { %p514_p3 = scmp.ne.s32.totalorder %s31_s19, %s513_s27  ;;  %p519_p5 = scmp.lt.s32.totalorder %s513_s27, %s513_s27 }
   0xc   :  { %p520_p6 = por %p519_p5, %p518_p4 }
   0xe   :  { %p521_p7 = pnand %p520_p6, %p514_p3 }
  0x10   :  { %524 = shalt.err (!%p521_p7)
}
  0x11   :  { %s598_s28 = smov 64   ;;  %s599_s29 = smov 4  }
  0x12   :  { %36 = dma.hbm_to_vmem [thread:$0]  %s702_s1, 1024, %s31_s19, [#allocation6], %s598_s28, %s598_s28, %s599_s29  }
  0x13   :  { %s600_s7 = smov [#allocation2]   ;;  %s525_s11 = scalar_lea.hbm %s701_s0, 512 }
  0x14   :  { %s18_s8 = sshll.u32 %s600_s7, 4  ;;  %p526_p8 = scmp.ne.s32.totalorder %s701_s0, %s525_s11  ;;  %s19_s8 = int_to_ptr.vmem [resolvable:$true] %s18_s8 }
  0x15   :  { %p529_p9 = scmp.lt.u32.totalorder %s525_s11, %s701_s0 }
  0x17   :  { %p531_p10 = pnand %p529_p9, %p526_p8 }
  0x19   :  { %534 = shalt.err (!%p531_p10)
}
  0x1a   :  { %s535_s16 = scalar_lea.vmem %s19_s8, 512  ;;  %p540_p12 = scmp.lt.s32.totalorder %s19_s8, %s19_s8 }
  0x1b   :  { %p536_p11 = scmp.ne.s32.totalorder %s19_s8, %s535_s16  ;;  %p541_p13 = scmp.lt.s32.totalorder %s535_s16, %s535_s16 }
  0x1d   :  { %p542_p0 = por %p541_p13, %p540_p12 }
  0x1f   :  { %p543_p1 = pnand %p542_p0, %p536_p11 }
  0x21   :  { %546 = shalt.err (!%p543_p1)
}
  0x22   :  { %s601_s1 = smov 128   ;;  %s602_s17 = smov 8  }
  0x23   :  { %24 = dma.hbm_to_vmem [thread:$0]  %s701_s0, 512, %s19_s8, [#allocation3], %s601_s1, %s601_s1, %s602_s17  }
  0x24   :  { %s603_s20 = smov [#allocation7]   ;;  %s547_s24 = scalar_lea.hbm %s704_s3, 1024 }
  0x25   :  { %s44_s21 = sshll.u32 %s603_s20, 4  ;;  %p548_p2 = scmp.ne.s32.totalorder %s704_s3, %s547_s24  ;;  %s45_s21 = int_to_ptr.vmem [resolvable:$true] %s44_s21 }
  0x26   :  { %p551_p3 = scmp.lt.u32.totalorder %s547_s24, %s704_s3 }
  0x28   :  { %p553_p4 = pnand %p551_p3, %p548_p2 }
  0x2a   :  { %556 = shalt.err (!%p553_p4)
}
  0x2b   :  { %s557_s6 = scalar_lea.vmem %s45_s21, 1024  ;;  %p562_p6 = scmp.lt.s32.totalorder %s45_s21, %s45_s21 }
  0x2c   :  { %p558_p5 = scmp.ne.s32.totalorder %s45_s21, %s557_s6  ;;  %p563_p7 = scmp.lt.s32.totalorder %s557_s6, %s557_s6 }
  0x2e   :  { %p564_p8 = por %p563_p7, %p562_p6 }
  0x30   :  { %p565_p9 = pnand %p564_p8, %p558_p5 }
  0x32   :  { %568 = shalt.err (!%p565_p9)
}
  0x33   :  { %50 = dma.hbm_to_vmem [thread:$0]  %s704_s3, 1024, %s45_s21, [#allocation6], %s598_s28, %s598_s28, %s599_s29  }
  0x34   :  { %591 = dma.done.wait [#allocation3], 512  }
  0x35   :  { %592 = vsyncadd [#allocation3], 4294966784 }
  0x36   :  { %593 = dma.done.wait [#allocation6], 2048  }
  0x37   :  { %594 = vsyncadd [#allocation6], 4294965248  ;;  %v471_v0 = vld [vmem:[#allocation5] sm:$0xff]   ;;  %v472_v1 = vld [vmem:[#allocation5 + $0x8] sm:$0xff]  }
  0x38   :  { %423 = vmatprep.subr.bf16.mxu0 %v471_v0  ;;  %v473_v2 = vld [vmem:[#allocation5 + $0x10] sm:$0xff]   ;;  %v474_v3 = vld [vmem:[#allocation5 + $0x18] sm:$0xff]   ;;  %v63_v4 = vld [vmem:[#allocation2] sm:$0xff] }
  0x39   :  { %424 = vmatpush3.bf16.msra.mxu0 %v471_v0  ;;  %v64_v5 = vld [vmem:[#allocation2 + $0x8] sm:$0xff]  ;;  %v479_v7 = vld [vmem:[#allocation7] sm:$0xff]   ;;  %v481_v10 = vld [vmem:[#allocation7 + $0x10] sm:$0xff]  }
  0x3a   :  { %425 = vmatprep.subr.bf16.mxu0 %v472_v1  ;;  %v67_v6 = vpack.c.bf16 %v64_v5, %v63_v4  ;;  %v480_v8 = vld [vmem:[#allocation7 + $0x8] sm:$0xff]   ;;  %v475_v9 = vld [vmem:[#allocation5 + $0x20] sm:$0xff]   ;;  %443 = vmatprep.subr.bf16.mxu1 %v479_v7  ;;  %v482_v12 = vld [vmem:[#allocation7 + $0x18] sm:$0xff]  }
  0x3b   :  { %444 = vmatpush3.bf16.msra.mxu1 %v479_v7  ;;  %v476_v11 = vld [vmem:[#allocation5 + $0x28] sm:$0xff]   ;;  %v477_v13 = vld [vmem:[#allocation5 + $0x30] sm:$0xff]   ;;  %v483_v14 = vld [vmem:[#allocation7 + $0x20] sm:$0xff]  }
  0x3c   :  { %439 = vmatprep.mubr.bf16.mxu0 %v67_v6  ;;  %445 = vmatprep.subr.bf16.mxu1 %v480_v8  ;;  %v478_v15 = vld [vmem:[#allocation5 + $0x38] sm:$0xff]   ;;  %v484_v16 = vld [vmem:[#allocation7 + $0x28] sm:$0xff]   ;;  %v65_v17 = vld [vmem:[#allocation2 + $0x10] sm:$0xff] }
  0x3d   :  { %426 = vmatpush3.bf16.msra.mxu0 %v472_v1  ;;  %v66_v18 = vld [vmem:[#allocation2 + $0x18] sm:$0xff]  ;;  %v485_v20 = vld [vmem:[#allocation7 + $0x30] sm:$0xff]   ;;  %v385_v22 = vld [vmem:[%s703_s2] ss:$0 sm:$0xff]  ;;  %s604_s2 = smov [#allocation8]  }
  0x3e   :  { %427 = vmatprep.subr.bf16.mxu0 %v473_v2  ;;  %v68_v19 = vpack.c.bf16 %v66_v18, %v65_v17  ;;  %v486_v21 = vld [vmem:[#allocation7 + $0x38] sm:$0xff]   ;;  %v394_v37 = vld [vmem:[%s705_s4] ss:$0 sm:$0xff]  ;;  %s372_s4 = sshll.u32 %s604_s2, 4  ;;  %s373_s4 = int_to_ptr.vmem [resolvable:$true] %s372_s4 }
  0x3f   :  { %446 = vmatpush3.bf16.msra.mxu1 %v480_v8  ;;  %s569_s9 = scalar_lea.vmem %s373_s4, 512  ;;  %p574_p11 = scmp.lt.s32.totalorder %s373_s4, %s373_s4 }
  0x40   :  { %447 = vmatprep.subr.bf16.mxu1 %v481_v10  ;;  %p570_p10 = scmp.ne.s32.totalorder %s373_s4, %s569_s9  ;;  %p575_p12 = scmp.lt.s32.totalorder %s569_s9, %s569_s9 }
  0x41   :  { %428 = vmatpush3.bf16.msra.mxu0 %v473_v2 }
  0x42   :  { %429 = vmatprep.subr.bf16.mxu0 %v474_v3  ;;  %p576_p13 = por %p575_p12, %p574_p11 }
  0x43   :  { %448 = vmatpush3.bf16.msra.mxu1 %v481_v10 }
  0x44   :  { %449 = vmatprep.subr.bf16.mxu1 %v482_v12  ;;  %p577_p0 = pnand %p576_p13, %p570_p10 }
  0x45   :  { %430 = vmatpush3.bf16.msra.mxu0 %v474_v3 }
  0x46   :  { %431 = vmatprep.subr.bf16.mxu0 %v475_v9 }
  0x47   :  { %450 = vmatpush3.bf16.msra.mxu1 %v482_v12 }
  0x48   :  { %451 = vmatprep.subr.bf16.mxu1 %v483_v14 }
  0x49   :  { %432 = vmatpush3.bf16.msra.mxu0 %v475_v9 }
  0x4a   :  { %433 = vmatprep.subr.bf16.mxu0 %v476_v11 }
  0x4b   :  { %452 = vmatpush3.bf16.msra.mxu1 %v483_v14 }
  0x4c   :  { %453 = vmatprep.subr.bf16.mxu1 %v484_v16 }
  0x4d   :  { %434 = vmatpush3.bf16.msra.mxu0 %v476_v11 }
  0x4e   :  { %435 = vmatprep.subr.bf16.mxu0 %v477_v13 }
  0x4f   :  { %454 = vmatpush3.bf16.msra.mxu1 %v484_v16 }
  0x50   :  { %455 = vmatprep.subr.bf16.mxu1 %v485_v20 }
  0x51   :  { %436 = vmatpush3.bf16.msra.mxu0 %v477_v13 }
  0x52   :  { %437 = vmatprep.subr.bf16.mxu0 %v478_v15 }
  0x53   :  { %456 = vmatpush3.bf16.msra.mxu1 %v485_v20 }
  0x54   :  { %457 = vmatprep.subr.bf16.mxu1 %v486_v21 }
  0x55   :  { %438 = vmatpush3.bf16.msra.mxu0 %v478_v15 }
  0x57   :  { %458 = vmatpush3.bf16.msra.mxu1 %v486_v21 }
  0x58   :  { %440 = vmatmul.mubr.bf16.vlgmr.msra.gmra.mrb[0].mxu0 %v68_v19 }
 0x12b   :  { %v441_v23 = vpop.f32.mrb[0].mxu0 }
 0x12c   :  { %v183_v24 = vadd.f32 %v441_v23, %v385_v22  ;;  %v174_v25 = vpop.f32.mrb[1].mxu0 }
 0x12d   :  { %v175_v26 = vadd.f32 %v385_v22, %v174_v25  ;;  %v442_v27 = vpop.f32.mrb[2].mxu0 }
 0x12e   :  { %v186_v28 = vadd.f32 %v442_v27, %v385_v22  ;;  %v177_v29 = vpop.f32.mrb[3].mxu0  ;;  %v191_v31 = vmax.f32 %v183_v24, 0.0 }
 0x12f   :  { %v178_v30 = vadd.f32 %v385_v22, %v177_v29  ;;  %v189_v33 = vmax.f32 %v175_v26, 0.0 }
 0x130   :  { %v192_v32 = vmax.f32 %v186_v28, 0.0 }
 0x131   :  { %v190_v34 = vmax.f32 %v178_v30, 0.0 }
 0x132   :  { %v194_v35 = vpack.c.bf16 %v192_v32, %v191_v31 }
 0x133   :  { %v193_v36 = vpack.c.bf16 %v190_v34, %v189_v33 }
 0x135   :  { %459 = vmatprep.mubr.bf16.mxu1 %v193_v36 }
 0x136   :  { %460 = vmatmul.mubr.bf16.vlgmr.msra.gmra.mrb[0].mxu1 %v194_v35 }
 0x209   :  { %v461_v38 = vpop.f32.mrb[0].mxu1 }
 0x20a   :  { %v309_v39 = vadd.f32 %v461_v38, %v394_v37  ;;  %v300_v40 = vpop.f32.mrb[1].mxu1 }
 0x20b   :  { %v301_v41 = vadd.f32 %v394_v37, %v300_v40  ;;  %v462_v42 = vpop.f32.mrb[2].mxu1 }
 0x20c   :  { %319 = vmax.xlane.f32.xlu1 %v309_v39  ;;  %v303_v43 = vpop.f32.mrb[3].mxu1  ;;  %v312_v44 = vadd.f32 %v462_v42, %v394_v37 }
 0x20d   :  { %315 = vmax.xlane.f32.xlu0 %v301_v41  ;;  %v304_v45 = vadd.f32 %v394_v37, %v303_v43 }
 0x210   :  { %321 = vmax.xlane.f32.xlu1 %v312_v44 }
 0x211   :  { %317 = vmax.xlane.f32.xlu0 %v304_v45 }
 0x299   :  { %v320_v46 = vpop.xlane.xlu1 %319 }
 0x29a   :  { %v325_v47 = vsub.f32 %v309_v39, %v320_v46  ;;  %v316_v48 = vpop.xlane.xlu0 %315 }
 0x29b   :  { %v323_v49 = vsub.f32 %v301_v41, %v316_v48 }
 0x29c   :  { %v331_v52 = vmul.f32 1.442695, %v325_v47 }
 0x29d   :  { %v327_v50 = vmul.f32 1.442695, %v323_v49  ;;  %v322_v51 = vpop.xlane.xlu1 %321 }
 0x29e   :  { %v318_v53 = vpop.xlane.xlu0 %317  ;;  %v326_v54 = vsub.f32 %v312_v44, %v322_v51 }
 0x29f   :  { %487 = vpow2.f32 %v327_v50  ;;  %v324_v55 = vsub.f32 %v304_v45, %v318_v53 }
 0x2a0   :  { %489 = vpow2.f32 %v331_v52  ;;  %v333_v57 = vmul.f32 1.442695, %v326_v54 }
 0x2a1   :  { %v329_v56 = vmul.f32 1.442695, %v324_v55 }
 0x2a3   :  { %491 = vpow2.f32 %v329_v56 }
 0x2a4   :  { %493 = vpow2.f32 %v333_v57 }
 0x2a9   :  { %v488_v58 = vpop.eup %487 }
 0x2aa   :  { %335 = vadd.xlane.f32.xlu0 %v488_v58  ;;  %v490_v59 = vpop.eup %489 }
 0x2ad   :  { %v492_v60 = vpop.eup %491 }
 0x2ae   :  { %339 = vadd.xlane.f32.xlu0 %v490_v59  ;;  %337 = vadd.xlane.f32.xlu1 %v492_v60  ;;  %v494_v61 = vpop.eup %493 }
 0x2b2   :  { %341 = vadd.xlane.f32.xlu1 %v494_v61 }
 0x337   :  { %v336_v62 = vpop.xlane.xlu0 %335 }
 0x338   :  { %495 = vrcp.f32 %v336_v62 }
 0x33b   :  { %v338_v63 = vpop.xlane.xlu1 %337  ;;  %v340_v0 = vpop.xlane.xlu0 %339 }
 0x33c   :  { %497 = vrcp.f32 %v338_v63 }
 0x33d   :  { %499 = vrcp.f32 %v340_v0 }
 0x33f   :  { %v342_v1 = vpop.xlane.xlu1 %341 }
 0x340   :  { %501 = vrcp.f32 %v342_v1 }
 0x342   :  { %v496_v2 = vpop.eup %495 }
 0x343   :  { %v347_v3 = vmul.f32 %v496_v2, %v336_v62 }
 0x345   :  { %v351_v4 = vsub.f32 2.0, %v347_v3 }
 0x346   :  { %v498_v5 = vpop.eup %497 }
 0x347   :  { %v500_v6 = vpop.eup %499  ;;  %v355_v7 = vmul.f32 %v496_v2, %v351_v4  ;;  %v348_v8 = vmul.f32 %v498_v5, %v338_v63 }
 0x348   :  { %v349_v9 = vmul.f32 %v500_v6, %v340_v0 }
 0x349   :  { %v359_v10 = vmul.f32 %v488_v58, %v355_v7  ;;  %v352_v11 = vsub.f32 2.0, %v348_v8 }
 0x34a   :  { %v502_v12 = vpop.eup %501  ;;  %v353_v13 = vsub.f32 2.0, %v349_v9 }
 0x34b   :  { %363 = vst [vmem:[#allocation8] sm:$0xff] %v359_v10  ;;  %v356_v14 = vmul.f32 %v498_v5, %v352_v11  ;;  %v350_v15 = vmul.f32 %v502_v12, %v342_v1 }
 0x34c   :  { %v357_v16 = vmul.f32 %v500_v6, %v353_v13 }
 0x34d   :  { %v360_v17 = vmul.f32 %v492_v60, %v356_v14  ;;  %v354_v18 = vsub.f32 2.0, %v350_v15 }
 0x34e   :  { %v361_v19 = vmul.f32 %v490_v59, %v357_v16 }
 0x34f   :  { %364 = vst [vmem:[#allocation8 + $0x8] sm:$0xff] %v360_v17  ;;  %v358_v20 = vmul.f32 %v502_v12, %v354_v18 }
 0x350   :  { %365 = vst [vmem:[#allocation8 + $0x10] sm:$0xff] %v361_v19 }
 0x351   :  { %v362_v21 = vmul.f32 %v494_v61, %v358_v20 }
 0x353   :  { %366 = vst [vmem:[#allocation8 + $0x18] sm:$0xff] %v362_v21 }
 0x354   :  { %580 = shalt.err (!%p577_p0)
}
 0x355   :  { %s581_s12 = scalar_lea.hbm %s706_s5, 512 }
 0x356   :  { %p582_p1 = scmp.ne.s32.totalorder %s706_s5, %s581_s12  ;;  %p585_p2 = scmp.lt.u32.totalorder %s581_s12, %s706_s5 }
 0x358   :  { %p587_p3 = pnand %p585_p2, %p582_p1 }
 0x35a   :  { %590 = shalt.err (!%p587_p3)
}
 0x35b   :  { %378 = dma.vmem_to_hbm [thread:$0]  %s373_s4, 512, %s706_s5, [#allocation4], %s601_s1, %s601_s1, %s602_s17  }
 0x35c   :  { %595 = dma.done.wait [#allocation4], 512  }
 0x35d   :  { %596 = vsyncadd [#allocation4], 4294966784 }
 0x35e   :  { %382 = vsyncpa [#allocation3], 1 }
 0x35f   :  { %383 = vsyncpa [#allocation6], 1 }
 0x360   :  { %384 = vsyncpa [#allocation4], 1 }

// kernel: tpu_custom_call.1
= control target key start
LH: loop header
LB: loop body
LE: loop exit
PB: predicated region body
PF: predicated region fallthrough
CT: control target
= control target key end

     0   :  { %10 = vsyncpa [#allocation3], 0  ;;  %s701_s0 = inlined_call_operand.hbm [shape: f32[32,128], index: 0, kind: input, shape index: {}]   ;;  %s702_s1 = inlined_call_operand.hbm [shape: bf16[128,128], index: 1, kind: input, shape index: {}]   ;;  %s703_s2 = inlined_call_operand.vmem [shape: f32[1,128], index: 2, kind: input, shape index: {}]   ;;  %s704_s3 = inlined_call_operand.hbm [shape: bf16[128,128], index: 3, kind: input, shape index: {}]   ;;  %s705_s4 = inlined_call_operand.vmem [shape: f32[1,128], index: 4, kind: input, shape index: {}]   ;;  %s706_s5 = inlined_call_operand.hbm [shape: f32[32,128], index: 5, kind: output, shape index: {}]  }
   0x1   :  { %11 = vsyncpa [#allocation6], 0 }
   0x2   :  { %12 = vsyncpa [#allocation4], 0  ;;  %s597_s18 = smov [#allocation5]   ;;  %s503_s22 = scalar_lea.hbm %s702_s1, 1024 }
   0x3   :  { %s30_s19 = sshll.u32 %s597_s18, 4  ;;  %p504_p0 = scmp.ne.s32.totalorder %s702_s1, %s503_s22  ;;  %s31_s19 = int_to_ptr.vmem [resolvable:$true] %s30_s19 }
   0x4   :  { %p507_p1 = scmp.lt.u32.totalorder %s503_s22, %s702_s1 }
   0x6   :  { %p509_p2 = pnand %p507_p1, %p504_p0 }
   0x8   :  { %512 = shalt.err (!%p509_p2)
}
   0x9   :  { %s513_s27 = scalar_lea.vmem %s31_s19, 1024  ;;  %p518_p4 = scmp.lt.s32.totalorder %s31_s19, %s31_s19 }
   0xa   :  { %p514_p3 = scmp.ne.s32.totalorder %s31_s19, %s513_s27  ;;  %p519_p5 = scmp.lt.s32.totalorder %s513_s27, %s513_s27 }
   0xc   :  { %p520_p6 = por %p519_p5, %p518_p4 }
   0xe   :  { %p521_p7 = pnand %p520_p6, %p514_p3 }
  0x10   :  { %524 = shalt.err (!%p521_p7)
}
  0x11   :  { %s598_s28 = smov 64   ;;  %s599_s29 = smov 4  }
  0x12   :  { %36 = dma.hbm_to_vmem [thread:$0]  %s702_s1, 1024, %s31_s19, [#allocation6], %s598_s28, %s598_s28, %s599_s29  }
  0x13   :  { %s600_s7 = smov [#allocation2]   ;;  %s525_s11 = scalar_lea.hbm %s701_s0, 512 }
  0x14   :  { %s18_s8 = sshll.u32 %s600_s7, 4  ;;  %p526_p8 = scmp.ne.s32.totalorder %s701_s0, %s525_s11  ;;  %s19_s8 = int_to_ptr.vmem [resolvable:$true] %s18_s8 }
  0x15   :  { %p529_p9 = scmp.lt.u32.totalorder %s525_s11, %s701_s0 }
  0x17   :  { %p531_p10 = pnand %p529_p9, %p526_p8 }
  0x19   :  { %534 = shalt.err (!%p531_p10)
}
  0x1a   :  { %s535_s16 = scalar_lea.vmem %s19_s8, 512  ;;  %p540_p12 = scmp.lt.s32.totalorder %s19_s8, %s19_s8 }
  0x1b   :  { %p536_p11 = scmp.ne.s32.totalorder %s19_s8, %s535_s16  ;;  %p541_p13 = scmp.lt.s32.totalorder %s535_s16, %s535_s16 }
  0x1d   :  { %p542_p0 = por %p541_p13, %p540_p12 }
  0x1f   :  { %p543_p1 = pnand %p542_p0, %p536_p11 }
  0x21   :  { %546 = shalt.err (!%p543_p1)
}
  0x22   :  { %s601_s1 = smov 128   ;;  %s602_s17 = smov 8  }
  0x23   :  { %24 = dma.hbm_to_vmem [thread:$0]  %s701_s0, 512, %s19_s8, [#allocation3], %s601_s1, %s601_s1, %s602_s17  }
  0x24   :  { %s603_s20 = smov [#allocation7]   ;;  %s547_s24 = scalar_lea.hbm %s704_s3, 1024 }
  0x25   :  { %s44_s21 = sshll.u32 %s603_s20, 4  ;;  %p548_p2 = scmp.ne.s32.totalorder %s704_s3, %s547_s24  ;;  %s45_s21 = int_to_ptr.vmem [resolvable:$true] %s44_s21 }
  0x26   :  { %p551_p3 = scmp.lt.u32.totalorder %s547_s24, %s704_s3 }
  0x28   :  { %p553_p4 = pnand %p551_p3, %p548_p2 }
  0x2a   :  { %556 = shalt.err (!%p553_p4)
}
  0x2b   :  { %s557_s6 = scalar_lea.vmem %s45_s21, 1024  ;;  %p562_p6 = scmp.lt.s32.totalorder %s45_s21, %s45_s21 }
  0x2c   :  { %p558_p5 = scmp.ne.s32.totalorder %s45_s21, %s557_s6  ;;  %p563_p7 = scmp.lt.s32.totalorder %s557_s6, %s557_s6 }
  0x2e   :  { %p564_p8 = por %p563_p7, %p562_p6 }
  0x30   :  { %p565_p9 = pnand %p564_p8, %p558_p5 }
  0x32   :  { %568 = shalt.err (!%p565_p9)
}
  0x33   :  { %50 = dma.hbm_to_vmem [thread:$0]  %s704_s3, 1024, %s45_s21, [#allocation6], %s598_s28, %s598_s28, %s599_s29  }
  0x34   :  { %591 = dma.done.wait [#allocation3], 512  }
  0x35   :  { %592 = vsyncadd [#allocation3], 4294966784 }
  0x36   :  { %593 = dma.done.wait [#allocation6], 2048  }
  0x37   :  { %594 = vsyncadd [#allocation6], 4294965248  ;;  %v471_v0 = vld [vmem:[#allocation5] sm:$0xff]   ;;  %v472_v1 = vld [vmem:[#allocation5 + $0x8] sm:$0xff]  }
  0x38   :  { %423 = vmatprep.subr.bf16.mxu0 %v471_v0  ;;  %v473_v2 = vld [vmem:[#allocation5 + $0x10] sm:$0xff]   ;;  %v474_v3 = vld [vmem:[#allocation5 + $0x18] sm:$0xff]   ;;  %v63_v4 = vld [vmem:[#allocation2] sm:$0xff] }
  0x39   :  { %424 = vmatpush3.bf16.msra.mxu0 %v471_v0  ;;  %v64_v5 = vld [vmem:[#allocation2 + $0x8] sm:$0xff]  ;;  %v479_v7 = vld [vmem:[#allocation7] sm:$0xff]   ;;  %v481_v10 = vld [vmem:[#allocation7 + $0x10] sm:$0xff]  }
  0x3a   :  { %425 = vmatprep.subr.bf16.mxu0 %v472_v1  ;;  %v67_v6 = vpack.c.bf16 %v64_v5, %v63_v4  ;;  %v480_v8 = vld [vmem:[#allocation7 + $0x8] sm:$0xff]   ;;  %v475_v9 = vld [vmem:[#allocation5 + $0x20] sm:$0xff]   ;;  %443 = vmatprep.subr.bf16.mxu1 %v479_v7  ;;  %v482_v12 = vld [vmem:[#allocation7 + $0x18] sm:$0xff]  }
  0x3b   :  { %444 = vmatpush3.bf16.msra.mxu1 %v479_v7  ;;  %v476_v11 = vld [vmem:[#allocation5 + $0x28] sm:$0xff]   ;;  %v477_v13 = vld [vmem:[#allocation5 + $0x30] sm:$0xff]   ;;  %v483_v14 = vld [vmem:[#allocation7 + $0x20] sm:$0xff]  }
  0x3c   :  { %439 = vmatprep.mubr.bf16.mxu0 %v67_v6  ;;  %445 = vmatprep.subr.bf16.mxu1 %v480_v8  ;;  %v478_v15 = vld [vmem:[#allocation5 + $0x38] sm:$0xff]   ;;  %v484_v16 = vld [vmem:[#allocation7 + $0x28] sm:$0xff]   ;;  %v65_v17 = vld [vmem:[#allocation2 + $0x10] sm:$0xff] }
  0x3d   :  { %426 = vmatpush3.bf16.msra.mxu0 %v472_v1  ;;  %v66_v18 = vld [vmem:[#allocation2 + $0x18] sm:$0xff]  ;;  %v485_v20 = vld [vmem:[#allocation7 + $0x30] sm:$0xff]   ;;  %v385_v22 = vld [vmem:[%s703_s2] ss:$0 sm:$0xff]  ;;  %s604_s2 = smov [#allocation8]  }
  0x3e   :  { %427 = vmatprep.subr.bf16.mxu0 %v473_v2  ;;  %v68_v19 = vpack.c.bf16 %v66_v18, %v65_v17  ;;  %v486_v21 = vld [vmem:[#allocation7 + $0x38] sm:$0xff]   ;;  %v394_v37 = vld [vmem:[%s705_s4] ss:$0 sm:$0xff]  ;;  %s372_s4 = sshll.u32 %s604_s2, 4  ;;  %s373_s4 = int_to_ptr.vmem [resolvable:$true] %s372_s4 }
  0x3f   :  { %446 = vmatpush3.bf16.msra.mxu1 %v480_v8  ;;  %s569_s9 = scalar_lea.vmem %s373_s4, 512  ;;  %p574_p11 = scmp.lt.s32.totalorder %s373_s4, %s373_s4 }
  0x40   :  { %447 = vmatprep.subr.bf16.mxu1 %v481_v10  ;;  %p570_p10 = scmp.ne.s32.totalorder %s373_s4, %s569_s9  ;;  %p575_p12 = scmp.lt.s32.totalorder %s569_s9, %s569_s9 }
  0x41   :  { %428 = vmatpush3.bf16.msra.mxu0 %v473_v2 }
  0x42   :  { %429 = vmatprep.subr.bf16.mxu0 %v474_v3  ;;  %p576_p13 = por %p575_p12, %p574_p11 }
  0x43   :  { %448 = vmatpush3.bf16.msra.mxu1 %v481_v10 }
  0x44   :  { %449 = vmatprep.subr.bf16.mxu1 %v482_v12  ;;  %p577_p0 = pnand %p576_p13, %p570_p10 }
  0x45   :  { %430 = vmatpush3.bf16.msra.mxu0 %v474_v3 }
  0x46   :  { %431 = vmatprep.subr.bf16.mxu0 %v475_v9 }
  0x47   :  { %450 = vmatpush3.bf16.msra.mxu1 %v482_v12 }
  0x48   :  { %451 = vmatprep.subr.bf16.mxu1 %v483_v14 }
  0x49   :  { %432 = vmatpush3.bf16.msra.mxu0 %v475_v9 }
  0x4a   :  { %433 = vmatprep.subr.bf16.mxu0 %v476_v11 }
  0x4b   :  { %452 = vmatpush3.bf16.msra.mxu1 %v483_v14 }
  0x4c   :  { %453 = vmatprep.subr.bf16.mxu1 %v484_v16 }
  0x4d   :  { %434 = vmatpush3.bf16.msra.mxu0 %v476_v11 }
  0x4e   :  { %435 = vmatprep.subr.bf16.mxu0 %v477_v13 }
  0x4f   :  { %454 = vmatpush3.bf16.msra.mxu1 %v484_v16 }
  0x50   :  { %455 = vmatprep.subr.bf16.mxu1 %v485_v20 }
  0x51   :  { %436 = vmatpush3.bf16.msra.mxu0 %v477_v13 }
  0x52   :  { %437 = vmatprep.subr.bf16.mxu0 %v478_v15 }
  0x53   :  { %456 = vmatpush3.bf16.msra.mxu1 %v485_v20 }
  0x54   :  { %457 = vmatprep.subr.bf16.mxu1 %v486_v21 }
  0x55   :  { %438 = vmatpush3.bf16.msra.mxu0 %v478_v15 }
  0x57   :  { %458 = vmatpush3.bf16.msra.mxu1 %v486_v21 }
  0x58   :  { %440 = vmatmul.mubr.bf16.vlgmr.msra.gmra.mrb[0].mxu0 %v68_v19 }
 0x12b   :  { %v441_v23 = vpop.f32.mrb[0].mxu0 }
 0x12c   :  { %v183_v24 = vadd.f32 %v441_v23, %v385_v22  ;;  %v174_v25 = vpop.f32.mrb[1].mxu0 }
 0x12d   :  { %v175_v26 = vadd.f32 %v385_v22, %v174_v25  ;;  %v442_v27 = vpop.f32.mrb[2].mxu0 }
 0x12e   :  { %v186_v28 = vadd.f32 %v442_v27, %v385_v22  ;;  %v177_v29 = vpop.f32.mrb[3].mxu0  ;;  %v191_v31 = vmax.f32 %v183_v24, 0.0 }
 0x12f   :  { %v178_v30 = vadd.f32 %v385_v22, %v177_v29  ;;  %v189_v33 = vmax.f32 %v175_v26, 0.0 }
 0x130   :  { %v192_v32 = vmax.f32 %v186_v28, 0.0 }
 0x131   :  { %v190_v34 = vmax.f32 %v178_v30, 0.0 }
 0x132   :  { %v194_v35 = vpack.c.bf16 %v192_v32, %v191_v31 }
 0x133   :  { %v193_v36 = vpack.c.bf16 %v190_v34, %v189_v33 }
 0x135   :  { %459 = vmatprep.mubr.bf16.mxu1 %v193_v36 }
 0x136   :  { %460 = vmatmul.mubr.bf16.vlgmr.msra.gmra.mrb[0].mxu1 %v194_v35 }
 0x209   :  { %v461_v38 = vpop.f32.mrb[0].mxu1 }
 0x20a   :  { %v309_v39 = vadd.f32 %v461_v38, %v394_v37  ;;  %v300_v40 = vpop.f32.mrb[1].mxu1 }
 0x20b   :  { %v301_v41 = vadd.f32 %v394_v37, %v300_v40  ;;  %v462_v42 = vpop.f32.mrb[2].mxu1 }
 0x20c   :  { %319 = vmax.xlane.f32.xlu1 %v309_v39  ;;  %v303_v43 = vpop.f32.mrb[3].mxu1  ;;  %v312_v44 = vadd.f32 %v462_v42, %v394_v37 }
 0x20d   :  { %315 = vmax.xlane.f32.xlu0 %v301_v41  ;;  %v304_v45 = vadd.f32 %v394_v37, %v303_v43 }
 0x210   :  { %321 = vmax.xlane.f32.xlu1 %v312_v44 }
 0x211   :  { %317 = vmax.xlane.f32.xlu0 %v304_v45 }
 0x299   :  { %v320_v46 = vpop.xlane.xlu1 %319 }
 0x29a   :  { %v325_v47 = vsub.f32 %v309_v39, %v320_v46  ;;  %v316_v48 = vpop.xlane.xlu0 %315 }
 0x29b   :  { %v323_v49 = vsub.f32 %v301_v41, %v316_v48 }
 0x29c   :  { %v331_v52 = vmul.f32 1.442695, %v325_v47 }
 0x29d   :  { %v327_v50 = vmul.f32 1.442695, %v323_v49  ;;  %v322_v51 = vpop.xlane.xlu1 %321 }
 0x29e   :  { %v318_v53 = vpop.xlane.xlu0 %317  ;;  %v326_v54 = vsub.f32 %v312_v44, %v322_v51 }
 0x29f   :  { %487 = vpow2.f32 %v327_v50  ;;  %v324_v55 = vsub.f32 %v304_v45, %v318_v53 }
 0x2a0   :  { %489 = vpow2.f32 %v331_v52  ;;  %v333_v57 = vmul.f32 1.442695, %v326_v54 }
 0x2a1   :  { %v329_v56 = vmul.f32 1.442695, %v324_v55 }
 0x2a3   :  { %491 = vpow2.f32 %v329_v56 }
 0x2a4   :  { %493 = vpow2.f32 %v333_v57 }
 0x2a9   :  { %v488_v58 = vpop.eup %487 }
 0x2aa   :  { %335 = vadd.xlane.f32.xlu0 %v488_v58  ;;  %v490_v59 = vpop.eup %489 }
 0x2ad   :  { %v492_v60 = vpop.eup %491 }
 0x2ae   :  { %339 = vadd.xlane.f32.xlu0 %v490_v59  ;;  %337 = vadd.xlane.f32.xlu1 %v492_v60  ;;  %v494_v61 = vpop.eup %493 }
 0x2b2   :  { %341 = vadd.xlane.f32.xlu1 %v494_v61 }
 0x337   :  { %v336_v62 = vpop.xlane.xlu0 %335 }
 0x338   :  { %495 = vrcp.f32 %v336_v62 }
 0x33b   :  { %v338_v63 = vpop.xlane.xlu1 %337  ;;  %v340_v0 = vpop.xlane.xlu0 %339 }
 0x33c   :  { %497 = vrcp.f32 %v338_v63 }
 0x33d   :  { %499 = vrcp.f32 %v340_v0 }
 0x33f   :  { %v342_v1 = vpop.xlane.xlu1 %341 }
 0x340   :  { %501 = vrcp.f32 %v342_v1 }
 0x342   :  { %v496_v2 = vpop.eup %495 }
 0x343   :  { %v347_v3 = vmul.f32 %v496_v2, %v336_v62 }
 0x345   :  { %v351_v4 = vsub.f32 2.0, %v347_v3 }
 0x346   :  { %v498_v5 = vpop.eup %497 }
 0x347   :  { %v500_v6 = vpop.eup %499  ;;  %v355_v7 = vmul.f32 %v496_v2, %v351_v4  ;;  %v348_v8 = vmul.f32 %v498_v5, %v338_v63 }
 0x348   :  { %v349_v9 = vmul.f32 %v500_v6, %v340_v0 }
 0x349   :  { %v359_v10 = vmul.f32 %v488_v58, %v355_v7  ;;  %v352_v11 = vsub.f32 2.0, %v348_v8 }
 0x34a   :  { %v502_v12 = vpop.eup %501  ;;  %v353_v13 = vsub.f32 2.0, %v349_v9 }
 0x34b   :  { %363 = vst [vmem:[#allocation8] sm:$0xff] %v359_v10  ;;  %v356_v14 = vmul.f32 %v498_v5, %v352_v11  ;;  %v350_v15 = vmul.f32 %v502_v12, %v342_v1 }
 0x34c   :  { %v357_v16 = vmul.f32 %v500_v6, %v353_v13 }
 0x34d   :  { %v360_v17 = vmul.f32 %v492_v60, %v356_v14  ;;  %v354_v18 = vsub.f32 2.0, %v350_v15 }
 0x34e   :  { %v361_v19 = vmul.f32 %v490_v59, %v357_v16 }
 0x34f   :  { %364 = vst [vmem:[#allocation8 + $0x8] sm:$0xff] %v360_v17  ;;  %v358_v20 = vmul.f32 %v502_v12, %v354_v18 }
 0x350   :  { %365 = vst [vmem:[#allocation8 + $0x10] sm:$0xff] %v361_v19 }
 0x351   :  { %v362_v21 = vmul.f32 %v494_v61, %v358_v20 }
 0x353   :  { %366 = vst [vmem:[#allocation8 + $0x18] sm:$0xff] %v362_v21 }
 0x354   :  { %580 = shalt.err (!%p577_p0)
}
 0x355   :  { %s581_s12 = scalar_lea.hbm %s706_s5, 512 }
 0x356   :  { %p582_p1 = scmp.ne.s32.totalorder %s706_s5, %s581_s12  ;;  %p585_p2 = scmp.lt.u32.totalorder %s581_s12, %s706_s5 }
 0x358   :  { %p587_p3 = pnand %p585_p2, %p582_p1 }
 0x35a   :  { %590 = shalt.err (!%p587_p3)
}
 0x35b   :  { %378 = dma.vmem_to_hbm [thread:$0]  %s373_s4, 512, %s706_s5, [#allocation4], %s601_s1, %s601_s1, %s602_s17  }
 0x35c   :  { %595 = dma.done.wait [#allocation4], 512  }
 0x35d   :  { %596 = vsyncadd [#allocation4], 4294966784 }
 0x35e   :  { %382 = vsyncpa [#allocation3], 1 }
 0x35f   :  { %383 = vsyncpa [#allocation6], 1 }
 0x360   :  { %384 = vsyncpa [#allocation4], 1 }

</bundles_post_ra>
